<compile_context>
chip_gen: v5e
topology: v5e:2x2
jax: 0.10.0
libtpu: 0.0.40
codegen_flags: <defaults>
</compile_context>

<pallas_src>
import functools

import jax
import jax.numpy as jnp
from jax.experimental import pallas as pl
from jax.experimental.pallas import tpu as pltpu


_MIB = 1024 * 1024
# Hard cap on streamed block size (elements): ~8 MiB of f32 per block keeps the
# per-step DMA far above the ~0.35 us pipeline overhead while leaving enough
# grid steps for good double-buffered overlap.
_BLOCK_ELEM_CAP = 2 * 1024 * 1024


def _vmem_budget():
    """(block byte budget, vmem_limit_bytes), derived from the chip's VMEM size."""
    try:
        cap = int(pltpu.get_tpu_info().vmem_capacity_bytes)
    except Exception:
        cap = 64 * _MIB                      # v7x-safe fallback
    cap = max(cap, 32 * _MIB)
    return int(cap * 0.45), int(cap * 0.75)  # ~48 MiB limit on v7x, ~96 MiB on v5e/v6e


def _round_up(x, m):
    return -(-x // m) * m


def _largest_divisor_leq(n, cap):
    cap = max(1, min(n, cap))
    for d in range(cap, 0, -1):
        if n % d == 0:
            return d
    return 1


def _plan_blocks(n, c_tile, hw, max_elems):
    """Pick (n_tile, l_tile) so one (n_tile, c_tile, l_tile) block ~= max_elems."""
    max_elems = max(max_elems, 8 * 128)
    max_l = (max_elems // c_tile) // 128 * 128
    if hw > max(max_l, 128):
        return 1, max(128, max_l)                 # large spatial: tile the lane axis
    max_n = max(1, max_elems // (c_tile * hw))    # small spatial: block over N
    return _largest_divisor_leq(n, max_n), hw


# ----------------------------------------------------------------------------
# Kernels
# ----------------------------------------------------------------------------
def _bn_fused_kernel(x_ref, w_ref, b_ref, o_ref, *, inv_count, eps):
    """Single-pass BN for one channel tile whose whole (N, C_tile, HW) slab is in VMEM."""
    n = x_ref.shape[0]
    c_t = w_ref.shape[0]
    unroll = n <= 8

    def _sum_body(i, acc):
        xs = x_ref[i].astype(jnp.float32)                       # (C_tile, HW)
        return acc + jnp.sum(xs, axis=-1, keepdims=True)

    s = jax.lax.fori_loop(0, n, _sum_body,
                          jnp.zeros((c_t, 1), jnp.float32), unroll=unroll)
    mean = s * inv_count                                        # (C_tile, 1)

    def _var_body(i, acc):                                      # centered variance
        d = x_ref[i].astype(jnp.float32) - mean
        return acc + jnp.sum(d * d, axis=-1, keepdims=True)

    q = jax.lax.fori_loop(0, n, _var_body,
                          jnp.zeros((c_t, 1), jnp.float32), unroll=unroll)
    var = q * inv_count

    scale = w_ref[...] * jax.lax.rsqrt(var + eps)               # (C_tile, 1)
    shift = b_ref[...] - mean * scale

    @pl.loop(0, n, unroll=unroll)
    def _write(i):
        xs = x_ref[i].astype(jnp.float32)
        o_ref[i] = (xs * scale + shift).astype(o_ref.dtype)


def _bn_stats_kernel(x_ref, psum_ref, psq_ref, *, l_tile, hw, ragged):
    """Per-(batch-tile, channel) partial sum / sum-of-squares, reduced over lane tiles."""
    li = pl.program_id(2)

    @pl.when(li == 0)
    def _init():
        psum_ref[...] = jnp.zeros_like(psum_ref)
        psq_ref[...] = jnp.zeros_like(psq_ref)

    n_tile, c_t, _ = x_ref.shape
    unroll = n_tile <= 8

    def _accum(mask):
        def body(i, carry):
            acc_s, acc_q = carry
            xs = x_ref[i].astype(jnp.float32)                   # (C_tile, L_tile)
            if mask is not None:
                xs = jnp.where(mask, xs, 0.0)
            acc_s = acc_s + jnp.sum(xs, axis=-1, keepdims=True)
            acc_q = acc_q + jnp.sum(xs * xs, axis=-1, keepdims=True)
            return acc_s, acc_q

        zero = jnp.zeros((c_t, 1), jnp.float32)
        acc_s, acc_q = jax.lax.fori_loop(0, n_tile, body, (zero, zero), unroll=unroll)
        psum_ref[...] += acc_s[None]
        psq_ref[...] += acc_q[None]

    if not ragged:
        _accum(None)
    else:
        # Only the ragged last lane tile pays for iota/compare/select.
        is_last = li == pl.num_programs(2) - 1

        @pl.when(jnp.logical_not(is_last))
        def _steady():
            _accum(None)

        @pl.when(is_last)
        def _tail():
            lane = jax.lax.broadcasted_iota(jnp.int32, (c_t, l_tile), 1) + li * l_tile
            _accum(lane < hw)


def _bn_apply_kernel(x_ref, scale_ref, shift_ref, o_ref):
    x = x_ref[...].astype(jnp.float32)                          # (N_tile, C_tile, L_tile)
    y = x * scale_ref[...][None] + shift_ref[...][None]         # broadcast (1, C_tile, 1)
    o_ref[...] = y.astype(o_ref.dtype)


# ----------------------------------------------------------------------------
# Wrapper
# ----------------------------------------------------------------------------
def btch_normalization(x, weight, bias, *, eps=1e-5,
                       force_two_pass=False, max_block_elems=None):
    """Batch norm over all dims except dim 1 (batch statistics, biased variance)."""
    orig_shape = x.shape
    N, C = int(orig_shape[0]), int(orig_shape[1])
    HW = 1
    for d in orig_shape[2:]:
        HW *= int(d)
    count = N * HW
    inv_count = 1.0 / count
    itemsize = jnp.dtype(x.dtype).itemsize
    unit = max(8, 32 // itemsize)            # dtype-aware sublane tiling unit

    budget, vmem_limit = _vmem_budget()

    x3d = x.reshape(N, C, HW)                # free view: channels->sublanes, spatial->lanes
    w2d = weight.astype(jnp.float32).reshape(C, 1)
    b2d = bias.astype(jnp.float32).reshape(C, 1)

    # ---------------- fused single-pass path ---------------------------------
    if not force_two_pass:
        # in+out double-buffered slabs (input dtype) + small per-row f32 temporaries
        per_ch = 4 * N * HW * itemsize + 32 * HW + 256
        ct_max = budget // per_ch
        if ct_max >= C:
            # Split channels ~in half when possible: >=2 grid steps gives DMA/compute
            # overlap and a parallel axis for v7x megacore.
            c_tile = C if C < 2 * unit else _round_up(-(-C // 2), unit)
        elif ct_max >= unit:
            c_tile = (ct_max // unit) * unit
        else:
            c_tile = 0
        if c_tile > 0:
            num_c = pl.cdiv(C, c_tile)
            c_pad = num_c * c_tile
            w_p = w2d if c_pad == C else jnp.pad(w2d, ((0, c_pad - C), (0, 0)),
                                                 constant_values=1.0)
            b_p = b2d if c_pad == C else jnp.pad(b2d, ((0, c_pad - C), (0, 0)))
            kernel = functools.partial(_bn_fused_kernel, inv_count=inv_count, eps=eps)
            out3d = pl.pallas_call(
                kernel,
                out_shape=jax.ShapeDtypeStruct((N, C, HW), x.dtype),
                grid_spec=pltpu.PrefetchScalarGridSpec(
                    num_scalar_prefetch=0,
                    grid=(num_c,),
                    in_specs=[pl.BlockSpec((N, c_tile, HW), lambda ci: (0, ci, 0)),
                              pl.BlockSpec((c_tile, 1), lambda ci: (ci, 0)),
                              pl.BlockSpec((c_tile, 1), lambda ci: (ci, 0))],
                    out_specs=pl.BlockSpec((N, c_tile, HW), lambda ci: (0, ci, 0))),
                compiler_params=pltpu.CompilerParams(
                    dimension_semantics=("parallel",),
                    vmem_limit_bytes=vmem_limit),
            )(x3d, w_p, b_p)
            return out3d.reshape(orig_shape)

    # ---------------- two-pass streaming path ---------------------------------
    c_tile = C if C <= 256 else (256 // unit) * unit
    num_c = pl.cdiv(C, c_tile)
    c_pad = num_c * c_tile

    # VMEM-budget-driven block sizes (elements), per pass:
    #   pass 1 double-buffers one input (+ f32 temporaries)
    #   pass 2 double-buffers input and output (+ f32 temporaries)
    p1_elems = min(budget // (2 * itemsize + 8), _BLOCK_ELEM_CAP)
    p2_elems = min(budget // (4 * itemsize + 8), _BLOCK_ELEM_CAP)
    if max_block_elems is not None:
        p1_elems = min(p1_elems, max_block_elems)
        p2_elems = min(p2_elems, max_block_elems)

    # ---- pass 1: per-channel partial sums / sums-of-squares ----
    n1, l1 = _plan_blocks(N, c_tile, HW, p1_elems)
    num_n1, num_l1 = N // n1, pl.cdiv(HW, l1)
    ragged1 = (HW % l1) != 0
    stats_kernel = functools.partial(_bn_stats_kernel, l_tile=l1, hw=HW, ragged=ragged1)
    psum, psq = pl.pallas_call(
        stats_kernel,
        out_shape=(jax.ShapeDtypeStruct((num_n1, c_pad, 1), jnp.float32),
                   jax.ShapeDtypeStruct((num_n1, c_pad, 1), jnp.float32)),
        grid_spec=pltpu.PrefetchScalarGridSpec(
            num_scalar_prefetch=0,
            grid=(num_c, num_n1, num_l1),
            in_specs=[pl.BlockSpec((n1, c_tile, l1), lambda ci, ni, li: (ni, ci, li))],
            out_specs=[pl.BlockSpec((1, c_tile, 1), lambda ci, ni, li: (ni, ci, 0)),
                       pl.BlockSpec((1, c_tile, 1), lambda ci, ni, li: (ni, ci, 0))]),
        compiler_params=pltpu.CompilerParams(
            dimension_semantics=("parallel", "parallel", "arbitrary"),
            vmem_limit_bytes=vmem_limit),
    )(x3d)

    # ---- tiny O(C) epilogue: reduce partials, fold stats + affine ----
    sums = jnp.sum(psum, axis=0)                                 # (c_pad, 1)
    sqs = jnp.sum(psq, axis=0)
    mean = sums * inv_count
    var = jnp.maximum(sqs * inv_count - mean * mean, 0.0)        # biased variance
    inv_std = jax.lax.rsqrt(var + eps)
    w_p = w2d if c_pad == C else jnp.pad(w2d, ((0, c_pad - C), (0, 0)), constant_values=1.0)
    b_p = b2d if c_pad == C else jnp.pad(b2d, ((0, c_pad - C), (0, 0)))
    scale = w_p * inv_std
    shift = b_p - mean * scale

    # ---- pass 2: y = x * scale + shift (streamed, lane-dense blocks) ----
    n2, l2 = _plan_blocks(N, c_tile, HW, p2_elems)
    num_n2, num_l2 = N // n2, pl.cdiv(HW, l2)
    out3d = pl.pallas_call(
        _bn_apply_kernel,
        out_shape=jax.ShapeDtypeStruct((N, C, HW), x.dtype),
        grid_spec=pltpu.PrefetchScalarGridSpec(
            num_scalar_prefetch=0,
            grid=(num_c, num_n2, num_l2),
            in_specs=[pl.BlockSpec((n2, c_tile, l2), lambda ci, ni, li: (ni, ci, li)),
                      pl.BlockSpec((c_tile, 1), lambda ci, ni, li: (ci, 0)),
                      pl.BlockSpec((c_tile, 1), lambda ci, ni, li: (ci, 0))],
            out_specs=pl.BlockSpec((n2, c_tile, l2), lambda ci, ni, li: (ni, ci, li))),
        compiler_params=pltpu.CompilerParams(
            dimension_semantics=("parallel", "parallel", "parallel"),
            vmem_limit_bytes=vmem_limit),
    )(x3d, scale, shift)

    return out3d.reshape(orig_shape)


# ----------------------------------------------------------------------------
# Self-test
# ----------------------------------------------------------------------------
def _reference(x, weight, bias, eps=1e-5):
    xf = x.astype(jnp.float32)
    axes = tuple(i for i in range(x.ndim) if i != 1)
    mean = jnp.mean(xf, axis=axes, keepdims=True)
    var = jnp.mean((xf - mean) ** 2, axis=axes, keepdims=True)
    shp = tuple(x.shape[1] if i == 1 else 1 for i in range(x.ndim))
    return (weight.astype(jnp.float32).reshape(shp) * (xf - mean)
            / jnp.sqrt(var + eps) + bias.astype(jnp.float32).reshape(shp))


if __name__ == "__main__":
    key = jax.random.PRNGKey(0)
    k1, k2, k3, k4, k5 = jax.random.split(key, 5)

    # --- test 1: module-default shapes (fused single-pass path) ---
    N, C, H, W = 2, 4, 16, 16
    x = jax.random.normal(k1, (N, C, H, W), dtype=jnp.float32)
    weight = jnp.ones((C,), dtype=jnp.float32)   # matches module __init__
    bias = jnp.zeros((C,), dtype=jnp.float32)
    out = jax.jit(btch_normalization)(x, weight, bias)
    jax.block_until_ready(out)
    ref = _reference(x, weight, bias)
    assert out.shape == x.shape and out.dtype == x.dtype
    assert jnp.allclose(out, ref, atol=2e-5, rtol=2e-5), float(jnp.max(jnp.abs(out - ref)))

    # --- test 2: same inputs through the two-pass streaming path ---
    out2 = jax.jit(functools.partial(btch_normalization, force_two_pass=True))(x, weight, bias)
    jax.block_until_ready(out2)
    assert jnp.allclose(out2, ref, atol=2e-5, rtol=2e-5), float(jnp.max(jnp.abs(out2 - ref)))

    # --- test 3: ragged lane tiles + affine params, forced small blocks ---
    x3 = jax.random.normal(k2, (3, 8, 10, 30), dtype=jnp.float32)   # HW = 300 -> ragged tail
    w3 = jax.random.normal(k3, (8,), dtype=jnp.float32)
    b3 = jax.random.normal(k4, (8,), dtype=jnp.float32)
    out3 = jax.jit(functools.partial(btch_normalization, force_two_pass=True,
                                     max_block_elems=1024))(x3, w3, b3)
    jax.block_until_ready(out3)
    ref3 = _reference(x3, w3, b3)
    assert jnp.allclose(out3, ref3, atol=1e-4, rtol=1e-4), float(jnp.max(jnp.abs(out3 - ref3)))

    # --- test 4: bf16 activations (fused path, dtype-aware tiling) ---
    xb = jax.random.normal(k5, (2, 16, 16, 16), dtype=jnp.float32).astype(jnp.bfloat16)
    wb = jnp.ones((16,), dtype=jnp.float32)
    bb = jnp.zeros((16,), dtype=jnp.float32)
    outb = jax.jit(btch_normalization)(xb, wb, bb)
    jax.block_until_ready(outb)
    refb = _reference(xb.astype(jnp.float32), wb, bb)
    assert outb.dtype == jnp.bfloat16
    assert jnp.allclose(outb.astype(jnp.float32), refb, atol=5e-2, rtol=5e-2)

    print("KERNEL_OK")
</pallas_src>

<mosaic_0001>
module attributes {stable_mosaic.version = 11 : i64} {
  func.func @_bn_fused_kernel(%arg0: i32, %arg1: memref<2x4x256xf32, #tpu.memory_space<vmem>>, %arg2: memref<4x1xf32, #tpu.memory_space<vmem>>, %arg3: memref<4x1xf32, #tpu.memory_space<vmem>>, %arg4: memref<2x4x256xf32, #tpu.memory_space<vmem>>) attributes {dimension_semantics = [#tpu.dimension_semantics<parallel>], iteration_bounds = array<i64: 1>, scalar_prefetch = 0 : i64, scratch_operands = 0 : i64, tpu.core_type = #tpu.core_type<tc>, window_params = [{transform_indices = @transform_0, window_bounds = array<i64: 2, 4, 256>}, {transform_indices = @transform_1, window_bounds = array<i64: 4, 1>}, {transform_indices = @transform_2, window_bounds = array<i64: 4, 1>}, {transform_indices = @transform_3, window_bounds = array<i64: 2, 4, 256>}]} {
    %cst = arith.constant 0.000000e+00 : f32
    %0 = vector.broadcast %cst : f32 to vector<4x1xf32>
    %c0_i32 = arith.constant 0 : i32
    %1 = arith.index_cast %c0_i32 : i32 to index
    %c0 = arith.constant 0 : index
    %c0_0 = arith.constant 0 : index
    %2 = vector.load %arg1[%1, %c0, %c0_0] : memref<2x4x256xf32, #tpu.memory_space<vmem>>, vector<1x4x256xf32>
    %3 = vector.shape_cast %2 : vector<1x4x256xf32> to vector<4x256xf32>
    %cst_1 = arith.constant dense<0.000000e+00> : vector<4xf32>
    %4 = vector.multi_reduction <add>, %3, %cst_1 [1] : vector<4x256xf32> to vector<4xf32>
    %5 = vector.shape_cast %4 : vector<4xf32> to vector<4x1xf32>
    %6 = arith.addf %0, %5 : vector<4x1xf32>
    %c1_i32 = arith.constant 1 : i32
    %7 = arith.index_cast %c1_i32 : i32 to index
    %c0_2 = arith.constant 0 : index
    %c0_3 = arith.constant 0 : index
    %8 = vector.load %arg1[%7, %c0_2, %c0_3] : memref<2x4x256xf32, #tpu.memory_space<vmem>>, vector<1x4x256xf32>
    %9 = vector.shape_cast %8 : vector<1x4x256xf32> to vector<4x256xf32>
    %cst_4 = arith.constant dense<0.000000e+00> : vector<4xf32>
    %10 = vector.multi_reduction <add>, %9, %cst_4 [1] : vector<4x256xf32> to vector<4xf32>
    %11 = vector.shape_cast %10 : vector<4xf32> to vector<4x1xf32>
    %12 = arith.addf %6, %11 : vector<4x1xf32>
    %c2_i32 = arith.constant 2 : i32
    %cst_5 = arith.constant 0.001953125 : f32
    %13 = vector.broadcast %cst_5 : f32 to vector<4x1xf32>
    %14 = arith.mulf %12, %13 : vector<4x1xf32>
    %cst_6 = arith.constant 0.000000e+00 : f32
    %15 = vector.broadcast %cst_6 : f32 to vector<4x1xf32>
    %c0_i32_7 = arith.constant 0 : i32
    %16 = arith.index_cast %c0_i32_7 : i32 to index
    %c0_8 = arith.constant 0 : index
    %c0_9 = arith.constant 0 : index
    %17 = vector.load %arg1[%16, %c0_8, %c0_9] : memref<2x4x256xf32, #tpu.memory_space<vmem>>, vector<1x4x256xf32>
    %18 = vector.shape_cast %17 : vector<1x4x256xf32> to vector<4x256xf32>
    %19 = vector.broadcast %14 : vector<4x1xf32> to vector<4x256xf32>
    %20 = arith.subf %18, %19 : vector<4x256xf32>
    %21 = arith.mulf %20, %20 : vector<4x256xf32>
    %cst_10 = arith.constant dense<0.000000e+00> : vector<4xf32>
    %22 = vector.multi_reduction <add>, %21, %cst_10 [1] : vector<4x256xf32> to vector<4xf32>
    %23 = vector.shape_cast %22 : vector<4xf32> to vector<4x1xf32>
    %24 = arith.addf %15, %23 : vector<4x1xf32>
    %c1_i32_11 = arith.constant 1 : i32
    %25 = arith.index_cast %c1_i32_11 : i32 to index
    %c0_12 = arith.constant 0 : index
    %c0_13 = arith.constant 0 : index
    %26 = vector.load %arg1[%25, %c0_12, %c0_13] : memref<2x4x256xf32, #tpu.memory_space<vmem>>, vector<1x4x256xf32>
    %27 = vector.shape_cast %26 : vector<1x4x256xf32> to vector<4x256xf32>
    %28 = vector.broadcast %14 : vector<4x1xf32> to vector<4x256xf32>
    %29 = arith.subf %27, %28 : vector<4x256xf32>
    %30 = arith.mulf %29, %29 : vector<4x256xf32>
    %cst_14 = arith.constant dense<0.000000e+00> : vector<4xf32>
    %31 = vector.multi_reduction <add>, %30, %cst_14 [1] : vector<4x256xf32> to vector<4xf32>
    %32 = vector.shape_cast %31 : vector<4xf32> to vector<4x1xf32>
    %33 = arith.addf %24, %32 : vector<4x1xf32>
    %c2_i32_15 = arith.constant 2 : i32
    %cst_16 = arith.constant 0.001953125 : f32
    %34 = vector.broadcast %cst_16 : f32 to vector<4x1xf32>
    %35 = arith.mulf %33, %34 : vector<4x1xf32>
    %c0_17 = arith.constant 0 : index
    %c0_18 = arith.constant 0 : index
    %36 = vector.load %arg2[%c0_17, %c0_18] : memref<4x1xf32, #tpu.memory_space<vmem>>, vector<4x1xf32>
    %cst_19 = arith.constant 9.99999974E-6 : f32
    %37 = vector.broadcast %cst_19 : f32 to vector<4x1xf32>
    %38 = arith.addf %35, %37 : vector<4x1xf32>
    %39 = math.rsqrt %38 : vector<4x1xf32>
    %40 = arith.mulf %36, %39 : vector<4x1xf32>
    %c0_20 = arith.constant 0 : index
    %c0_21 = arith.constant 0 : index
    %41 = vector.load %arg3[%c0_20, %c0_21] : memref<4x1xf32, #tpu.memory_space<vmem>>, vector<4x1xf32>
    %42 = arith.mulf %14, %40 : vector<4x1xf32>
    %43 = arith.subf %41, %42 : vector<4x1xf32>
    %c0_i32_22 = arith.constant 0 : i32
    %c1_i32_23 = arith.constant 1 : i32
    %44 = arith.muli %c0_i32_22, %c1_i32_23 : i32
    %c0_i32_24 = arith.constant 0 : i32
    %45 = arith.addi %c0_i32_24, %44 : i32
    %46 = arith.index_cast %45 : i32 to index
    %c0_25 = arith.constant 0 : index
    %c0_26 = arith.constant 0 : index
    %47 = vector.load %arg1[%46, %c0_25, %c0_26] : memref<2x4x256xf32, #tpu.memory_space<vmem>>, vector<1x4x256xf32>
    %48 = vector.shape_cast %47 : vector<1x4x256xf32> to vector<4x256xf32>
    %49 = vector.broadcast %40 : vector<4x1xf32> to vector<4x256xf32>
    %50 = arith.mulf %48, %49 : vector<4x256xf32>
    %51 = vector.broadcast %43 : vector<4x1xf32> to vector<4x256xf32>
    %52 = arith.addf %50, %51 : vector<4x256xf32>
    %53 = arith.index_cast %45 : i32 to index
    %c0_27 = arith.constant 0 : index
    %c0_28 = arith.constant 0 : index
    %54 = vector.load %arg4[%53, %c0_27, %c0_28] : memref<2x4x256xf32, #tpu.memory_space<vmem>>, vector<1x4x256xf32>
    %55 = vector.shape_cast %54 : vector<1x4x256xf32> to vector<4x256xf32>
    %56 = vector.shape_cast %52 : vector<4x256xf32> to vector<1x4x256xf32>
    tpu.vector_store %arg4[%53, %c0_27, %c0_28], %56 {strides = array<i32>} : memref<2x4x256xf32, #tpu.memory_space<vmem>>, vector<1x4x256xf32>,
    %c1_i32_29 = arith.constant 1 : i32
    %c1_i32_30 = arith.constant 1 : i32
    %57 = arith.muli %c1_i32_29, %c1_i32_30 : i32
    %c0_i32_31 = arith.constant 0 : i32
    %58 = arith.addi %c0_i32_31, %57 : i32
    %59 = arith.index_cast %58 : i32 to index
    %c0_32 = arith.constant 0 : index
    %c0_33 = arith.constant 0 : index
    %60 = vector.load %arg1[%59, %c0_32, %c0_33] : memref<2x4x256xf32, #tpu.memory_space<vmem>>, vector<1x4x256xf32>
    %61 = vector.shape_cast %60 : vector<1x4x256xf32> to vector<4x256xf32>
    %62 = vector.broadcast %40 : vector<4x1xf32> to vector<4x256xf32>
    %63 = arith.mulf %61, %62 : vector<4x256xf32>
    %64 = vector.broadcast %43 : vector<4x1xf32> to vector<4x256xf32>
    %65 = arith.addf %63, %64 : vector<4x256xf32>
    %66 = arith.index_cast %58 : i32 to index
    %c0_34 = arith.constant 0 : index
    %c0_35 = arith.constant 0 : index
    %67 = vector.load %arg4[%66, %c0_34, %c0_35] : memref<2x4x256xf32, #tpu.memory_space<vmem>>, vector<1x4x256xf32>
    %68 = vector.shape_cast %67 : vector<1x4x256xf32> to vector<4x256xf32>
    %69 = vector.shape_cast %65 : vector<4x256xf32> to vector<1x4x256xf32>
    tpu.vector_store %arg4[%66, %c0_34, %c0_35], %69 {strides = array<i32>} : memref<2x4x256xf32, #tpu.memory_space<vmem>>, vector<1x4x256xf32>,
    %c2_i32_36 = arith.constant 2 : i32
    return
  }
  func.func @transform_0(%arg0: i32) -> (i32, i32, i32) {
    %c0_i32 = arith.constant 0 : i32
    %c0_i32_0 = arith.constant 0 : i32
    %c0_i32_1 = arith.constant 0 : i32
    return %c0_i32, %arg0, %c0_i32_0 : i32, i32, i32
  }
  func.func @transform_1(%arg0: i32) -> (i32, i32) {
    %c0_i32 = arith.constant 0 : i32
    %c0_i32_0 = arith.constant 0 : i32
    return %arg0, %c0_i32 : i32, i32
  }
  func.func @transform_2(%arg0: i32) -> (i32, i32) {
    %c0_i32 = arith.constant 0 : i32
    %c0_i32_0 = arith.constant 0 : i32
    return %arg0, %c0_i32 : i32, i32
  }
  func.func @transform_3(%arg0: i32) -> (i32, i32, i32) {
    %c0_i32 = arith.constant 0 : i32
    %c0_i32_0 = arith.constant 0 : i32
    %c0_i32_1 = arith.constant 0 : i32
    return %c0_i32, %arg0, %c0_i32_0 : i32, i32, i32
  }
}

</mosaic_0001>

<bundles_post_ra>
// kernel: btch_normalization.1
= control target key start
LH: loop header
LB: loop body
LE: loop exit
PB: predicated region body
PF: predicated region fallthrough
CT: control target
= control target key end

     0   :  { %vm21_vm0 = vcmask 1043456   ;;  %v133_v13 = vmov 839922192   ;;  %v134_v34 = vmov 0   ;;  %s191_s0 = inlined_call_operand.vmem [shape: f32[2,4,256], index: 0, kind: input, shape index: {}]   ;;  %s192_s1 = inlined_call_operand.vmem [shape: f32[4,1], index: 1, kind: input, shape index: {}]   ;;  %s193_s2 = inlined_call_operand.vmem [shape: f32[4,1], index: 2, kind: input, shape index: {}]   ;;  %s194_s3 = inlined_call_operand.vmem [shape: f32[2,4,256], index: 3, kind: output, shape index: {}]  }
   0x1   :  { %v158_v0 = vld [vmem:[%s191_s0] sm:$0xff]  ;;  %v164_v1 = vld [vmem:[%s191_s0 + $0x8] sm:$0xff]  ;;  %v45_v14 = vunpack.c.l.s4 %v133_v13  ;;  %129 = vset.pattern.permute.xlu2 %v134_v34  ;;  %130 = vset.pattern.permute.xlu0 %v134_v34 }
   0x2   :  { %16 = vst [vmem:[#allocation1] ss:$2 sm:$0xff] %v158_v0  ;;  %v78_v45 = vld [vmem:[%s192_s1] sm:$0xf] }
   0x3   :  { %v46_v16 = vunpack.c.0.s8 %v45_v14  ;;  %v91_v50 = vld [vmem:[%s193_s2] sm:$0xf] }
   0x9   :  { %v17_v2 = vld.sshfl [vmem:[#allocation1] sm:$0xff pattern:$0x75316420]  ;;  %v18_v3 = vld.sshfl [vmem:[#allocation1 + $0x8] sm:$0xff pattern:$0x75316420] }
   0xa   :  { %v22_v4 = vsel %vm21_vm0, %v17_v2, 0.0  ;;  %v23_v5 = vsel %vm21_vm0, %v18_v3, 0.0  ;;  %31 = vst [vmem:[#allocation1] ss:$2 sm:$0xff] %v164_v1 }
   0xb   :  { %v24_v6 = vadd.f32 %v23_v5, %v22_v4 }
   0xd   :  { %25 = vadd.xlane.f32.xlu0 %v24_v6 }
  0x11   :  { %v32_v7 = vld.sshfl [vmem:[#allocation1] sm:$0xff pattern:$0x75316420]  ;;  %v33_v8 = vld.sshfl [vmem:[#allocation1 + $0x8] sm:$0xff pattern:$0x75316420] }
  0x12   :  { %v36_v9 = vsel %vm21_vm0, %v32_v7, 0.0  ;;  %v37_v10 = vsel %vm21_vm0, %v33_v8, 0.0 }
  0x13   :  { %v38_v11 = vadd.f32 %v37_v10, %v36_v9 }
  0x15   :  { %39 = vadd.xlane.f32.xlu0 %v38_v11 }
  0x80   :  { %v26_v12 = vpop.xlane.xlu0 %25 }
  0x88   :  { %v40_v15 = vpop.xlane.xlu0 %39 }
  0x89   :  { %v41_v17 = vadd.f32 %v40_v15, %v26_v12 }
  0x8b   :  { %v42_v18 = vmul.f32 0.001953125, %v41_v17 }
  0x8d   :  { %v47_v19 = vperm.slane %v42_v18, %v46_v16 }
  0x8f   :  { %v49_v20 = vsub.f32 %v158_v0, %v47_v19  ;;  %v63_v22 = vsub.f32 %v164_v1, %v47_v19 }
  0x91   :  { %v50_v21 = vmul.f32 %v49_v20, %v49_v20  ;;  %v64_v23 = vmul.f32 %v63_v22, %v63_v22 }
  0x93   :  { %52 = vst [vmem:[#allocation1] ss:$2 sm:$0xff] %v50_v21 }
  0x9a   :  { %v53_v24 = vld.sshfl [vmem:[#allocation1] sm:$0xff pattern:$0x75316420]  ;;  %v54_v25 = vld.sshfl [vmem:[#allocation1 + $0x8] sm:$0xff pattern:$0x75316420] }
  0x9b   :  { %v57_v26 = vsel %vm21_vm0, %v53_v24, 0.0  ;;  %v58_v27 = vsel %vm21_vm0, %v54_v25, 0.0  ;;  %66 = vst [vmem:[#allocation1] ss:$2 sm:$0xff] %v64_v23 }
  0x9c   :  { %v59_v28 = vadd.f32 %v58_v27, %v57_v26 }
  0x9e   :  { %60 = vadd.xlane.f32.xlu1 %v59_v28 }
  0xa2   :  { %v67_v29 = vld.sshfl [vmem:[#allocation1] sm:$0xff pattern:$0x75316420]  ;;  %v68_v30 = vld.sshfl [vmem:[#allocation1 + $0x8] sm:$0xff pattern:$0x75316420] }
  0xa3   :  { %v71_v31 = vsel %vm21_vm0, %v67_v29, 0.0  ;;  %v72_v32 = vsel %vm21_vm0, %v68_v30, 0.0 }
  0xa4   :  { %v73_v33 = vadd.f32 %v72_v32, %v71_v31 }
  0xa6   :  { %74 = vadd.xlane.f32.xlu1 %v73_v33 }
 0x111   :  { %v61_v35 = vpop.xlane.xlu1 %60 }
 0x119   :  { %v75_v36 = vpop.xlane.xlu1 %74 }
 0x11a   :  { %v76_v37 = vadd.f32 %v75_v36, %v61_v35 }
 0x11c   :  { %v77_v38 = vmul.f32 0.001953125, %v76_v37 }
 0x11e   :  { %v79_v39 = vadd.f32 1e-05, %v77_v38 }
 0x120   :  { %131 = vrsqrt.f32 %v79_v39  ;;  %vm86_vm2 = vweird.f32 %v79_v39 }
 0x126   :  { %v132_v40 = vpop.eup %131 }
 0x127   :  { %v81_v41 = vmul.f32 %v132_v40, %v79_v39  ;;  %vm87_vm1 = vweird.f32 %v132_v40 }
 0x128   :  { %vm88_vm3 = vmor %vm86_vm2, %vm87_vm1 }
 0x129   :  { %v82_v42 = vmul.f32 %v132_v40, %v81_v41 }
 0x12b   :  { %v83_v43 = vmul.f32 0.5, %v82_v42 }
 0x12d   :  { %v84_v44 = vsub.f32 1.5, %v83_v43 }
 0x12f   :  { %v85_v46 = vmul.f32 %v132_v40, %v84_v44 }
 0x131   :  { %v89_v47 = vsel %vm88_vm3, %v132_v40, %v85_v46 }
 0x132   :  { %v90_v48 = vmul.f32 %v89_v47, %v78_v45 }
 0x134   :  { %96 = vperm.xlu2 %129, %v90_v48   ;;  %v92_v49 = vmul.f32 %v90_v48, %v42_v18 }
 0x136   :  { %v93_v51 = vsub.f32 %v91_v50, %v92_v49 }
 0x13c   :  { %106 = vperm.xlu2 %129, %v93_v51  }
 0x18e   :  { %v97_v52 = vpop.permute.xlu2 %96 }
 0x18f   :  { %v101_v53 = vperm.slane %v97_v52, %v46_v16 }
 0x191   :  { %v103_v55 = vmul.f32 %v101_v53, %v158_v0  ;;  %v116_v56 = vmul.f32 %v164_v1, %v101_v53 }
 0x196   :  { %v107_v54 = vpop.permute.xlu2 %106 }
 0x197   :  { %v111_v57 = vperm.slane %v107_v54, %v46_v16 }
 0x199   :  { %v113_v58 = vadd.f32 %v111_v57, %v103_v55  ;;  %v117_v59 = vadd.f32 %v116_v56, %v111_v57 }
 0x19b   :  { %114 = vst [vmem:[%s194_s3] sm:$0xff] %v113_v58 }
 0x19c   :  { %126 = vst [vmem:[%s194_s3 + $0x8] sm:$0xff] %v117_v59 }

</bundles_post_ra>
